<compile_context>
chip_gen: v6e
topology: v6e:2x2x1
jax: 0.10.0
libtpu: 0.0.40
codegen_flags: <defaults>
</compile_context>

<pallas_src>
import functools

import jax
import jax.numpy as jnp
from jax.experimental import pallas as pl
from jax.experimental.pallas import tpu as pltpu


def _round_up(v, m):
    return -(-v // m) * m


def _seghead_kernel(x_ref, w1x_ref, bias1_ref, w2_ref, b2_ref, out_ref):
    # x_ref:    (1, C, TILE_N)   compute dtype (bf16 or f32)
    # w1x_ref:  (3C, C)          compute dtype  (BN-folded, x-columns of w1)
    # bias1_ref:(1, 3C, 1)       f32 (per-batch: b1_folded + w1_max@max + w1_mean@mean)
    # w2_ref:   (K_pad, 3C)      compute dtype
    # b2_ref:   (K_pad, 1)       f32
    # out_ref:  (1, K_pad, TILE_N) f32

    # Conv1d(k=1) #1: contraction only over C; global-feat terms live in bias1.
    h = jnp.dot(w1x_ref[...], x_ref[0], preferred_element_type=jnp.float32)   # (3C, T)
    h = jnp.maximum(h + bias1_ref[0], 0.0)        # bias (+ folded BN) + ReLU, f32 VPU
    # TODO(synk): training-mode dropout (stochastic mask) not implemented; eval = identity.

    # Conv1d(k=1) #2: 3C -> K_pad (zero-padded rows beyond num_classes).
    logits = jnp.dot(w2_ref[...], h.astype(w2_ref.dtype),
                     preferred_element_type=jnp.float32)                      # (K_pad, T)
    out_ref[0] = (logits + b2_ref[...]).astype(out_ref.dtype)


@functools.partial(jax.jit, static_argnames=("tile_n", "compute_dtype"))
def seghead_forward(x, w1, b1, bn_scale, bn_bias, w2, b2,
                    *, tile_n=2048, compute_dtype=jnp.bfloat16):
    B, C, N = x.shape
    C3 = w1.shape[0]          # 3 * C for global_feat='max,avg'
    K = w2.shape[0]

    x32 = x.astype(jnp.float32)

    # --- cheap XLA pre-pass: exact f32 global reductions over points ---------
    x_max = jnp.max(x32, axis=-1)     # (B, C)
    x_mean = jnp.mean(x32, axis=-1)   # (B, C)

    # --- fold BatchNorm1d (running stats) into conv-1 weights/bias -----------
    w1f = w1.astype(jnp.float32) * bn_scale                     # (3C, 3C), row-scaled
    b1f = bn_scale * b1.astype(jnp.float32) + bn_bias           # (3C, 1)

    # --- split w1 columns: [x | max | mean] (matches concat order) -----------
    w1_x = w1f[:, :C]
    w1_max = w1f[:, C:2 * C]
    w1_mean = w1f[:, 2 * C:3 * C]

    # Global-feature contributions collapse into a per-batch bias (B, 3C, 1).
    bias1 = (x_max @ w1_max.T + x_mean @ w1_mean.T
             + b1f.reshape(1, C3)).astype(jnp.float32)[:, :, None]

    # --- pad output channels to a multiple of 8 (sublane-aligned stores) -----
    K_pad = _round_up(K, 8)
    w2p = jnp.zeros((K_pad, C3), jnp.float32).at[:K].set(w2.astype(jnp.float32))
    b2p = jnp.zeros((K_pad, 1), jnp.float32).at[:K].set(b2.astype(jnp.float32))

    # --- lane tiling: TILE_N multiple of 128, pad N with zero columns --------
    tile = _round_up(min(int(tile_n), _round_up(N, 128)), 128)
    n_pad = _round_up(N, tile)
    x_p = jnp.pad(x32, ((0, 0), (0, 0), (0, n_pad - N))).astype(compute_dtype)

    w1_x_c = w1_x.astype(compute_dtype)
    w2_c = w2p.astype(compute_dtype)

    grid = (B, n_pad // tile)

    out = pl.pallas_call(
        _seghead_kernel,
        out_shape=jax.ShapeDtypeStruct((B, K_pad, n_pad), jnp.float32),
        grid_spec=pltpu.PrefetchScalarGridSpec(
            num_scalar_prefetch=0,
            grid=grid,
            in_specs=[
                pl.BlockSpec((1, C, tile), lambda b, n: (b, 0, n)),     # x tile (streamed)
                pl.BlockSpec((C3, C), lambda b, n: (0, 0)),             # w1_x (resident)
                pl.BlockSpec((1, C3, 1), lambda b, n: (b, 0, 0)),       # per-batch bias
                pl.BlockSpec((K_pad, C3), lambda b, n: (0, 0)),         # w2 (resident)
                pl.BlockSpec((K_pad, 1), lambda b, n: (0, 0)),          # b2 (resident)
            ],
            out_specs=pl.BlockSpec((1, K_pad, tile), lambda b, n: (b, 0, n)),
        ),
        compiler_params=pltpu.CompilerParams(
            dimension_semantics=("parallel", "parallel")),
    )(x_p, w1_x_c, bias1, w2_c, b2p)

    return out[:, :K, :N]


def seghead_reference(x, w1, b1, bn_scale, bn_bias, w2, b2):
    """Pure-JAX reference mirroring the PyTorch forward (eval mode)."""
    x = x.astype(jnp.float32)
    g_max = jnp.max(x, axis=-1, keepdims=True)
    g_mean = jnp.mean(x, axis=-1, keepdims=True)
    g = jnp.concatenate([g_max, g_mean], axis=1)
    g = jnp.broadcast_to(g, (x.shape[0], g.shape[1], x.shape[-1]))
    feat = jnp.concatenate([x, g], axis=1)                               # (B, 3C, N)
    hp = jax.lax.Precision.HIGHEST
    h = jnp.einsum('oi,bin->bon', w1, feat, precision=hp) + b1[None]
    h = h * bn_scale[None] + bn_bias[None]
    h = jnp.maximum(h, 0.0)
    return jnp.einsum('oi,bin->bon', w2, h, precision=hp) + b2[None]


if __name__ == "__main__":
    # Small shapes consistent with SegHead: in_channels=16, global_feat='max,avg'
    # => head width 3*16=48, num_classes=13, B=2, N=512 points (4 lane tiles of 128).
    B, C, N = 2, 16, 512
    C3 = 3 * C
    NUM_CLASSES = 13

    key = jax.random.PRNGKey(0)
    k_x, k_w1, k_b1, k_g, k_beta, k_w2, k_b2, k_rm, k_rv = jax.random.split(key, 9)

    x = jax.random.normal(k_x, (B, C, N), dtype=jnp.float32)

    # Conv1d(3C -> 3C, k=1) weights (squeezed kernel dim) + bias.
    w1 = 0.1 * jax.random.normal(k_w1, (C3, C3), dtype=jnp.float32)
    b1 = 0.1 * jax.random.normal(k_b1, (C3, 1), dtype=jnp.float32)

    # BatchNorm1d(3C) running stats + affine, pre-folded: y = x*scale + bias.
    gamma = 1.0 + 0.05 * jax.random.normal(k_g, (C3,), dtype=jnp.float32)
    beta = 0.05 * jax.random.normal(k_beta, (C3,), dtype=jnp.float32)
    running_mean = 0.1 * jax.random.normal(k_rm, (C3,), dtype=jnp.float32)
    running_var = 1.0 + 0.1 * jax.random.uniform(k_rv, (C3,), dtype=jnp.float32)
    eps = 1e-5
    inv_std = 1.0 / jnp.sqrt(running_var + eps)
    bn_scale = (gamma * inv_std).reshape(C3, 1)
    bn_bias = (beta - running_mean * gamma * inv_std).reshape(C3, 1)

    # Final Conv1d(3C -> num_classes, k=1), no norm / act.
    w2 = 0.1 * jax.random.normal(k_w2, (NUM_CLASSES, C3), dtype=jnp.float32)
    b2 = 0.1 * jax.random.normal(k_b2, (NUM_CLASSES, 1), dtype=jnp.float32)

    ref = seghead_reference(x, w1, b1, bn_scale, bn_bias, w2, b2)

    # f32 path: tight semantic check (tile_n=128 exercises the tiled grid).
    logits_f32 = jax.block_until_ready(
        seghead_forward(x, w1, b1, bn_scale, bn_bias, w2, b2,
                        tile_n=128, compute_dtype=jnp.float32))
    assert logits_f32.shape == (B, NUM_CLASSES, N)
    assert jnp.allclose(logits_f32, ref, atol=2e-3, rtol=2e-3), \
        float(jnp.max(jnp.abs(logits_f32 - ref)))

    # bf16 MXU fast path: looser tolerance (bf16 operand rounding).
    logits_bf16 = jax.block_until_ready(
        seghead_forward(x, w1, b1, bn_scale, bn_bias, w2, b2,
                        tile_n=128, compute_dtype=jnp.bfloat16))
    assert logits_bf16.shape == (B, NUM_CLASSES, N)
    assert jnp.allclose(logits_bf16, ref, atol=6e-2, rtol=6e-2), \
        float(jnp.max(jnp.abs(logits_bf16 - ref)))

    print("KERNEL_OK")
</pallas_src>

<mosaic_0001>
module attributes {stable_mosaic.version = 11 : i64} {
  func.func @_seghead_kernel(%arg0: i32, %arg1: i32, %arg2: memref<1x16x128xf32, #tpu.memory_space<vmem>>, %arg3: memref<48x16xf32, #tpu.memory_space<vmem>>, %arg4: memref<1x48x1xf32, #tpu.memory_space<vmem>>, %arg5: memref<16x48xf32, #tpu.memory_space<vmem>>, %arg6: memref<16x1xf32, #tpu.memory_space<vmem>>, %arg7: memref<1x16x128xf32, #tpu.memory_space<vmem>>) attributes {dimension_semantics = [#tpu.dimension_semantics<parallel>, #tpu.dimension_semantics<parallel>], iteration_bounds = array<i64: 2, 4>, scalar_prefetch = 0 : i64, scratch_operands = 0 : i64, tpu.core_type = #tpu.core_type<tc>, window_params = [{transform_indices = @transform_0, window_bounds = array<i64: 1, 16, 128>}, {pipeline_mode = #tpu.pipeline_mode<synchronous>, transform_indices = @transform_1, window_bounds = array<i64: 48, 16>}, {transform_indices = @transform_2, window_bounds = array<i64: 1, 48, 1>}, {pipeline_mode = #tpu.pipeline_mode<synchronous>, transform_indices = @transform_3, window_bounds = array<i64: 16, 48>}, {pipeline_mode = #tpu.pipeline_mode<synchronous>, transform_indices = @transform_4, window_bounds = array<i64: 16, 1>}, {transform_indices = @transform_5, window_bounds = array<i64: 1, 16, 128>}]} {
    %c0 = arith.constant 0 : index
    %c0_0 = arith.constant 0 : index
    %0 = vector.load %arg3[%c0, %c0_0] : memref<48x16xf32, #tpu.memory_space<vmem>>, vector<48x16xf32>
    %c0_1 = arith.constant 0 : index
    %c0_2 = arith.constant 0 : index
    %c0_3 = arith.constant 0 : index
    %1 = vector.load %arg2[%c0_1, %c0_2, %c0_3] : memref<1x16x128xf32, #tpu.memory_space<vmem>>, vector<1x16x128xf32>
    %2 = vector.shape_cast %1 : vector<1x16x128xf32> to vector<16x128xf32>
    %cst = arith.constant dense<0.000000e+00> : vector<48x128xf32>
    %3 = tpu.matmul %0, %2, %cst {dimension_numbers = #tpu.dot_dimension_numbers<[1], [0], [0], [1], [0, 0, 1, 1], [], []>} : vector<48x16xf32>, vector<16x128xf32>, vector<48x128xf32> -> vector<48x128xf32>
    %c0_4 = arith.constant 0 : index
    %c0_5 = arith.constant 0 : index
    %c0_6 = arith.constant 0 : index
    %4 = vector.load %arg4[%c0_4, %c0_5, %c0_6] : memref<1x48x1xf32, #tpu.memory_space<vmem>>, vector<1x48x1xf32>
    %5 = vector.shape_cast %4 : vector<1x48x1xf32> to vector<48x1xf32>
    %6 = vector.broadcast %5 : vector<48x1xf32> to vector<48x128xf32>
    %7 = arith.addf %3, %6 : vector<48x128xf32>
    %cst_7 = arith.constant 0.000000e+00 : f32
    %8 = vector.broadcast %cst_7 : f32 to vector<48x128xf32>
    %9 = arith.maximumf %7, %8 : vector<48x128xf32>
    %c0_8 = arith.constant 0 : index
    %c0_9 = arith.constant 0 : index
    %10 = vector.load %arg5[%c0_8, %c0_9] : memref<16x48xf32, #tpu.memory_space<vmem>>, vector<16x48xf32>
    %cst_10 = arith.constant dense<0.000000e+00> : vector<16x128xf32>
    %11 = tpu.matmul %10, %9, %cst_10 {dimension_numbers = #tpu.dot_dimension_numbers<[1], [0], [0], [1], [0, 0, 1, 1], [], []>} : vector<16x48xf32>, vector<48x128xf32>, vector<16x128xf32> -> vector<16x128xf32>
    %c0_11 = arith.constant 0 : index
    %c0_12 = arith.constant 0 : index
    %12 = vector.load %arg6[%c0_11, %c0_12] : memref<16x1xf32, #tpu.memory_space<vmem>>, vector<16x1xf32>
    %13 = vector.broadcast %12 : vector<16x1xf32> to vector<16x128xf32>
    %14 = arith.addf %11, %13 : vector<16x128xf32>
    %c0_13 = arith.constant 0 : index
    %c0_14 = arith.constant 0 : index
    %c0_15 = arith.constant 0 : index
    %15 = vector.load %arg7[%c0_13, %c0_14, %c0_15] : memref<1x16x128xf32, #tpu.memory_space<vmem>>, vector<1x16x128xf32>
    %16 = vector.shape_cast %15 : vector<1x16x128xf32> to vector<16x128xf32>
    %17 = vector.shape_cast %14 : vector<16x128xf32> to vector<1x16x128xf32>
    tpu.vector_store %arg7[%c0_13, %c0_14, %c0_15], %17 {strides = array<i32>} : memref<1x16x128xf32, #tpu.memory_space<vmem>>, vector<1x16x128xf32>,
    return
  }
  func.func @transform_0(%arg0: i32, %arg1: i32) -> (i32, i32, i32) {
    %c0_i32 = arith.constant 0 : i32
    %c0_i32_0 = arith.constant 0 : i32
    return %arg0, %c0_i32, %arg1 : i32, i32, i32
  }
  func.func @transform_1(%arg0: i32, %arg1: i32) -> (i32, i32) {
    %c0_i32 = arith.constant 0 : i32
    %c0_i32_0 = arith.constant 0 : i32
    %c0_i32_1 = arith.constant 0 : i32
    return %c0_i32, %c0_i32_0 : i32, i32
  }
  func.func @transform_2(%arg0: i32, %arg1: i32) -> (i32, i32, i32) {
    %c0_i32 = arith.constant 0 : i32
    %c0_i32_0 = arith.constant 0 : i32
    %c0_i32_1 = arith.constant 0 : i32
    return %arg0, %c0_i32, %c0_i32_0 : i32, i32, i32
  }
  func.func @transform_3(%arg0: i32, %arg1: i32) -> (i32, i32) {
    %c0_i32 = arith.constant 0 : i32
    %c0_i32_0 = arith.constant 0 : i32
    %c0_i32_1 = arith.constant 0 : i32
    return %c0_i32, %c0_i32_0 : i32, i32
  }
  func.func @transform_4(%arg0: i32, %arg1: i32) -> (i32, i32) {
    %c0_i32 = arith.constant 0 : i32
    %c0_i32_0 = arith.constant 0 : i32
    %c0_i32_1 = arith.constant 0 : i32
    return %c0_i32, %c0_i32_0 : i32, i32
  }
  func.func @transform_5(%arg0: i32, %arg1: i32) -> (i32, i32, i32) {
    %c0_i32 = arith.constant 0 : i32
    %c0_i32_0 = arith.constant 0 : i32
    return %arg0, %c0_i32, %arg1 : i32, i32, i32
  }
}

</mosaic_0001>

<bundles_post_ra>
// kernel: seghead_forward.1
= control target key start
LH: loop header
LB: loop body
LE: loop exit
PB: predicated region body
PF: predicated region fallthrough
CT: control target
= control target key end

     0   :  { %s905_s18 = smov 0   ;;  %s907_s19 = smov 0   ;;  %s1048_s0 = inlined_call_operand.vmem [shape: f32[2,16,512], index: 0, kind: input, shape index: {}]   ;;  %s1049_s1 = inlined_call_operand.vmem [shape: f32[48,16], index: 1, kind: input, shape index: {}]   ;;  %s1050_s2 = inlined_call_operand.vmem [shape: f32[2,48,1], index: 2, kind: input, shape index: {}]   ;;  %s1051_s3 = inlined_call_operand.vmem [shape: f32[16,48], index: 3, kind: input, shape index: {}]   ;;  %s1052_s4 = inlined_call_operand.vmem [shape: f32[16,1], index: 4, kind: input, shape index: {}]   ;;  %s1053_s5 = inlined_call_operand.vmem [shape: f32[2,16,512], index: 5, kind: output, shape index: {}]  }
   0x1   :  { %s909_s20 = smov 0   ;;  %s911_s21 = smov 0  }
   0x2   :  { %s913_s22 = smov 0   ;;  %s915_s23 = smov 0  }
   0x3   :  { %s917_s24 = smov 0  }
   0x4 LB: > { %s24_s25 = sadd.s32 1, %s864_s22  ;;  %s27_s26 = sadd.s32 1, %s868_s23  ;;  %s872_s24 = sphi %s917_s24, %s15_s24   ;;  %s868_s23 = sphi %s915_s23, %s1060_s23   ;;  %s864_s22 = sphi %s913_s22, %s1059_s22   ;;  %s860_s21 = sphi %s911_s21, %s1058_s21   ;;  %s856_s20 = sphi %s909_s20, %s1057_s20   ;;  %s852_s19 = sphi %s907_s19, %s1056_s19   ;;  %s848_s18 = sphi %s905_s18, %s1055_s18  }
   0x5   : > { %p25_p0 = scmp.ge.s32.totalorder %s24_s25, 4  ;;  %s690_s27 = sadd.s32 4294967295, %s872_s24  }
   0x6   : > { %p43_p1 = scmp.ne.s32.totalorder %s852_s19, %s848_s18  ;;  %p44_p2 = scmp.eq.s32.totalorder %s872_s24, 0 }
   0x7   : > { %s1062_s25 = smov (%p25_p0, %s24_s25), 0  ;;  %s1064_s26 = smov (!%p25_p0, %s27_s26), %s868_s23 }
   0x8   : > { %p29_p3 = scmp.ge.s32.totalorder %s1064_s26, 2  ;;  %p164_p4 = scmp.eq.s32.totalorder %s690_s27, 7 }
   0x9   : > { %s32_s28 = ssub.s32 %s864_s22, %s1062_s25  ;;  %p45_p5 = por %p44_p2, %p43_p1 }
   0xa   : > { %s1066_s26 = smov (%p29_p3, %s1064_s26), 0  ;;  %p953_p6 = por %p164_p4, %p43_p1 }
   0xb   : > { %s31_s30 = ssub.s32 %s868_s23, %s1066_s26  ;;  %s36_s7 = sadd.s32 1, %s852_s19 }
   0xc   : > { %s33_s6 = sor.u32 %s32_s28, %s31_s30  ;;  %p693_p8 = scmp.ge.s32.totalorder %s872_s24, 8 }
   0xd   : > { %p34_p7 = scmp.eq.s32.totalorder %s33_s6, 0 }
   0xe   : > { %195 = sbr.rel (%p693_p8) target bundleno = 27 (0x1b), region = 28 }
   0xf   : > { %s961_s8 = scalar_select %p34_p7, %s852_s19, %s36_s7  }
  0x13   : > { %198 = sbr.rel (!%p45_p5) target bundleno = 27 (0x1b), region = 32  ;;  %s200_s9 = sand.u32 (%p45_p5), 1, %s852_s19  }
  0x14   : > { %s695_s10 = sshll.u32 (%p45_p5), %s868_s23, 3  ;;  %s694_s11 = sshll.u32 (%p45_p5), %s200_s9, 4 }
  0x15   : > { %s204_s12 = sadd.s32 (%p45_p5), %s864_s22, %s695_s10  ;;  %s202_s17 = scalar_lea.vmem (%p45_p5), [#allocation2], %s694_s11 }
  0x16   : > { %s696_s13 = sshll.u32 (%p45_p5), %s204_s12, 3 }
  0x17   : > { %s206_s16 = scalar_lea.vmem (%p45_p5), %s1048_s0, %s696_s13 }
  0x18   : > { %v237_v0 = vld [vmem:[%s206_s16] sm:$0xff] }
  0x19   : > { %v239_v1 = vld [vmem:[%s206_s16 + $0x20] sm:$0xff]  ;;  %238 = vst [vmem:[%s202_s17] sm:$0xff] %v237_v0 }
  0x1a   : > { %240 = vst [vmem:[%s202_s17 + $0x8] sm:$0xff] %v239_v1 }
  0x1b PF: > { %p697_p9 = scmp.ge.s32.totalorder %s872_s24, 1  ;;  %p253_p10 = scmp.lt.s32.totalorder %s872_s24, 9 }
  0x1d   : > { %p254_p11 = pnand %p697_p9, %p253_p10 }
  0x1e   : > { %s260_s27 = sand.u32 (!%p254_p11), 1, %s848_s18   ;;  %p291_p12 = scmp.lt.s32.totalorder (!%p254_p11), %s860_s21, 1 }
  0x1f   : > { %257 = sbr.rel (%p254_p11) target bundleno = 465 (0x1d1), region = 74  ;;  %s976_s6 = sshll.u32 (!%p254_p11), %s260_s27, 4 }
  0x20   : > { %s262_s7 = scalar_lea.vmem (!%p254_p11), [#allocation2], %s976_s6  ;;  %s290_s17 = scalar_lea.vmem (!%p254_p11), [#allocation3], %s976_s6 }
  0x24   : > { %v296_v2 = vld [vmem:[%s1049_s1] sm:$0xff]  ;;  %vm340_vm0 = vcmask 130048   ;;  %v874_v3 = vmov 0   ;;  %v303_v4 = vld [vmem:[%s262_s7 + $0x8] sm:$0xff]  ;;  %s292_s9 = scalar_select %p291_p12, %s860_s21, 1  ;;  %v298_v7 = vld [vmem:[%s1049_s1 + $0x10] sm:$0xff] }
  0x25   : > { %734 = vmatprep.mubr.msk.f32.mxu0 %vm340_vm0, %v296_v2  ;;  %816 = vset.pattern.permute.xlu0 %v874_v3  ;;  %v302_v5 = vld [vmem:[%s262_s7] sm:$0xff]  ;;  %v297_v6 = vld [vmem:[%s1049_s1 + $0x8] sm:$0xff]  ;;  %v299_v10 = vld [vmem:[%s1049_s1 + $0x18] sm:$0xff]  ;;  %vm474_vm1 = vcmask 392192   ;;  %s710_s27 = sshll.u32 (%p953_p6), %s860_s21, 3 }
  0x26   : > { %817 = vset.pattern.permute.xlu1 %v874_v3  ;;  %730 = vmatprep.subr.mxu0 %v303_v4  ;;  %s758_s11 = smul.u32 48, %s292_s9  ;;  %v300_v11 = vld [vmem:[%s1049_s1 + $0x20] sm:$0xff]  ;;  %v301_v14 = vld [vmem:[%s1049_s1 + $0x28] sm:$0xff]  ;;  %s566_s28 = sadd.s32 (%p953_p6), %s856_s20, %s710_s27 }
  0x27   : > { %731 = vmatpush3.msra.mxu0 %v303_v4  ;;  %v462_v17 = vld [vmem:[%s1052_s4] sm:$0xff]  ;;  %v463_v18 = vld [vmem:[%s1052_s4 + $0x8] sm:$0xff]  ;;  %s711_s30 = sshll.u32 (%p953_p6), %s566_s28, 3 }
  0x28   : > { %732 = vmatprep.subr.mxu0 %v302_v5  ;;  %s295_s16 = scalar_lea.vmem %s1050_s2, %s758_s11  ;;  %v460_v19 = vld [vmem:[%s1051_s3] sm:$0xff]  ;;  %v461_v44 = vld [vmem:[%s1051_s3 + $0x8] sm:$0xff]  ;;  %s568_s18 = scalar_lea.vmem (%p953_p6), %s1053_s5, %s711_s30 }
  0x29   : > { %733 = vmatpush3.msra.mxu0 %v302_v5  ;;  %v309_v8 = vld [vmem:[%s295_s16 + $0x28] sm:$0xff]  ;;  %v307_v9 = vld [vmem:[%s295_s16 + $0x18] sm:$0xff]  ;;  %v308_v12 = vld [vmem:[%s295_s16 + $0x20] sm:$0xff]  ;;  %755 = vmatprep.mubr.msk.f32.mxu1 %vm474_vm1, %v460_v19 }
  0x2a   : > { %735 = vmatmul.mubr.msk.f32.vlgmr.msra.gmra.mxu0 %vm340_vm0, %v297_v6  ;;  %337 = vperm.xlu0 %816, %v309_v8   ;;  %v306_v13 = vld [vmem:[%s295_s16 + $0x10] sm:$0xff]  ;;  %v305_v15 = vld [vmem:[%s295_s16 + $0x8] sm:$0xff]  ;;  %v304_v16 = vld [vmem:[%s295_s16] sm:$0xff] }
  0x2b   : > { %737 = vmatprep.mubr.msk.f32.mxu0 %vm340_vm0, %v298_v7  ;;  %327 = vperm.xlu1 %817, %v307_v9  }
  0x2e   : > { %738 = vmatmul.mubr.msk.f32.gmra.mxu0 %vm340_vm0, %v299_v10  ;;  %332 = vperm.xlu0 %816, %v308_v12  }
  0x2f   : > { %740 = vmatprep.mubr.msk.f32.mxu0 %vm340_vm0, %v300_v11  ;;  %322 = vperm.xlu1 %817, %v306_v13  }
  0x32   : > { %741 = vmatmul.mubr.msk.f32.gmra.mxu0 %vm340_vm0, %v301_v14  ;;  %317 = vperm.xlu0 %816, %v305_v15  }
  0x33   : > { %312 = vperm.xlu1 %817, %v304_v16  }
  0x36   : > { %466 = vperm.xlu0 %816, %v462_v17  }
  0x37   : > { %471 = vperm.xlu1 %817, %v463_v18  }
  0xa5   : > { %v338_v20 = vpop.permute.xlu0 %337 }
  0xa6   : > { %v328_v22 = vpop.permute.xlu1 %327 }
  0xa9   : > { %v333_v25 = vpop.permute.xlu0 %332 }
  0xaa   : > { %v323_v27 = vpop.permute.xlu1 %322 }
  0xad   : > { %v318_v34 = vpop.permute.xlu0 %317 }
  0xae   : > { %v313_v37 = vpop.permute.xlu1 %312 }
  0xb1   : > { %v467_v48 = vpop.permute.xlu0 %466 }
  0xb2   : > { %v472_v45 = vpop.permute.xlu1 %471 }
  0xea   : > { %v736_v21 = vpop.f32.mrf.mxu0 }
  0xeb   : > { %v431_v38 = vadd.f32 %v736_v21, %v318_v34 }
  0xec   : > { %v425_v23 = vpop.f32.mrf.mxu0 }
  0xed   : > { %v426_v40 = vadd.f32 %v425_v23, %v313_v37  ;;  %v455_v42 = vmax.f32 %v431_v38, 0.0 }
  0xee   : > { %v739_v24 = vpop.f32.mrf.mxu0 }
  0xef   : > { %v441_v31 = vadd.f32 %v739_v24, %v328_v22  ;;  %v454_v43 = vmax.f32 %v426_v40, 0.0 }
  0xf0   : > { %v435_v26 = vpop.f32.mrf.mxu0 }
  0xf1   : > { %v436_v35 = vadd.f32 %v435_v26, %v323_v27  ;;  %v457_v39 = vmax.f32 %v441_v31, 0.0 }
  0xf2   : > { %v742_v28 = vpop.f32.mrf.mxu0 }
  0xf3   : > { %v451_v29 = vadd.f32 %v742_v28, %v338_v20  ;;  %v456_v41 = vmax.f32 %v436_v35, 0.0 }
  0xf4   : > { %v445_v30 = vpop.f32.mrf.mxu0 }
  0xf5   : > { %v459_v32 = vmax.f32 %v451_v29, 0.0  ;;  %v446_v33 = vadd.f32 %v445_v30, %v333_v25 }
  0xf7   : > { %v458_v36 = vmax.f32 %v446_v33, 0.0  ;;  %743 = vmatprep.subr.mxu1 %v459_v32 }
  0xf8   : > { %744 = vmatpush3.msra.mxu1 %v459_v32 }
  0xf9   : > { %745 = vmatprep.subr.mxu1 %v458_v36 }
  0xfa   : > { %746 = vmatpush3.msra.mxu1 %v458_v36 }
  0xfb   : > { %747 = vmatprep.subr.mxu1 %v457_v39 }
  0xfc   : > { %748 = vmatpush3.msra.mxu1 %v457_v39 }
  0xfd   : > { %749 = vmatprep.subr.mxu1 %v456_v41 }
  0xfe   : > { %750 = vmatpush3.msra.mxu1 %v456_v41 }
  0xff   : > { %751 = vmatprep.subr.mxu1 %v455_v42 }
 0x100   : > { %752 = vmatpush3.msra.mxu1 %v455_v42 }
 0x101   : > { %753 = vmatprep.subr.mxu1 %v454_v43 }
 0x102   : > { %754 = vmatpush3.msra.mxu1 %v454_v43 }
 0x103   : > { %756 = vmatmul.mubr.msk.f32.vlgmr.msra.gmra.mxu1 %vm474_vm1, %v461_v44 }
 0x1c3   : > { %v757_v46 = vpop.f32.mrf.mxu1 }
 0x1c4   : > { %v553_v47 = vadd.f32 %v757_v46, %v472_v45  ;;  %564 = sbr.rel (!%p953_p6) target bundleno = 465 (0x1d1), region = 82 }
 0x1c5   : > { %v547_v49 = vpop.f32.mrf.mxu1 }
 0x1c6   : > { %557 = vst [vmem:[%s290_s17 + $0x8] sm:$0xff] %v553_v47  ;;  %v548_v50 = vadd.f32 %v547_v49, %v467_v48 }
 0x1c8   : > { %556 = vst [vmem:[%s290_s17] sm:$0xff] %v548_v50 }
 0x1cd   : > { %v601_v52 = vld [vmem:[%s290_s17 + $0x8] sm:$0xff] }
 0x1ce   : > { %602 = vst [vmem:[%s568_s18 + $0x20] sm:$0xff] %v601_v52 }
 0x1cf   : > { %v599_v51 = vld [vmem:[%s290_s17] sm:$0xff] }
 0x1d0   : > { %600 = vst [vmem:[%s568_s18] sm:$0xff] %v599_v51 }
 0x1d1 PF: > { %s15_s24 = sadd.s32 1, %s872_s24   ;;  %s1055_s18 = smov %s852_s19 }
 0x1d2   : > { %p12_p13 = scmp.ge.s32.totalorder %s15_s24, 10   ;;  %s1056_s19 = smov %s961_s8 }
 0x1d3   : > { %s1057_s20 = smov %s864_s22  ;;  %s1058_s21 = smov %s868_s23 }
 0x1d4   : > { %s1059_s22 = smov %s1062_s25  ;;  %s1060_s23 = smov %s1066_s26 }
 0x1d5   :  { %14 = sbr.rel (!%p12_p13) target bundleno = 4 (0x4), region = 154 }

</bundles_post_ra>
